<compile_context>
chip_gen: v7x
topology: tpu7x:2x2x1
jax: 0.10.0
libtpu: 0.0.40
codegen_flags: <defaults>
</compile_context>

<pallas_src>
import numpy as np
import jax
import jax.numpy as jnp
from jax.experimental import pallas as pl
from jax.experimental.pallas import tpu as pltpu


def _cdiv(a, b):
    return (a + b - 1) // b


def _make_kernel(pair_specs):
    """pair_specs: list over l of [(row_a, row_b, weight), ...] with STATIC rows
    (global sublane indices into the packed slab) and Python-float weights."""

    def kernel(x_ref, o_ref):
        # x_ref : VMEM block (Mp, TR) -- all m rows of all l (packed), rows on
        #         sublanes, flattened (n_env, n_feat) on lanes.
        # o_ref : VMEM block (nL, TR) -- one output row per l, lane-dense.
        tr = o_ref.shape[1]
        rows = []
        for pairs in pair_specs:                     # static unroll over l
            acc = None
            for (ra, rb, w) in pairs:                # static unroll over pairs
                term = w * (x_ref[ra:ra + 1, :] * x_ref[rb:rb + 1, :])
                acc = term if acc is None else acc + term
            if acc is None:                          # degenerate all-zero CG block
                acc = jnp.zeros((1, tr), jnp.float32)
            rows.append(acc)
        o_ref[...] = jnp.concatenate(rows, axis=0)

    return kernel


def powerspectrum_pallas(X_dict, cg_blocks):
    """X_dict: {str(l): [n_env, n_feat, 2l+1]}, cg_blocks: {str(l): [2l+1, 2l+1]}.

    Returns [n_env, (L+1) * n_feat], identical to Powerspectrum(clebsch)(X)."""
    ls = sorted(int(k) for k in X_dict.keys())
    nL = len(ls)

    # --- shape checks (the Pallas path requires a common (n_env, n_feat)) ------
    n_env, n_feat, _ = X_dict[str(ls[0])].shape
    for l in ls:
        s = X_dict[str(l)].shape
        assert s[0] == n_env and s[1] == n_feat and s[2] == 2 * l + 1, (
            f"X[{l}] has shape {s}; expected ({n_env}, {n_feat}, {2 * l + 1})")
    R = n_env * n_feat

    # --- packed-slab row layout -------------------------------------------------
    m_sizes = [2 * l + 1 for l in ls]
    offsets = np.concatenate([[0], np.cumsum(m_sizes)]).astype(int)
    M_tot = int(offsets[-1])                       # = (L+1)^2 for contiguous l
    Mp = max(8, _cdiv(M_tot, 8) * 8)               # sublane-padded row count

    # --- bake symmetrized CG pair weights (handles arbitrary C_l exactly) -------
    pair_specs = []
    for li, l in enumerate(ls):
        m = m_sizes[li]
        C = np.asarray(cg_blocks[str(l)], dtype=np.float64)
        assert C.shape == (m, m)
        off = int(offsets[li])
        pairs = []
        for i in range(m):
            if C[i, i] != 0.0:
                pairs.append((off + i, off + i, float(C[i, i])))
            for j in range(i + 1, m):
                w = float(C[i, j] + C[j, i])
                if w != 0.0:
                    pairs.append((off + i, off + j, w))
        pair_specs.append(pairs)

    # --- adaptive lane tile: amortize per-step overhead, bounded by VMEM --------
    R128 = _cdiv(R, 128) * 128
    n_cols = R128 // 128                                     # 128-lane columns
    bytes_per_col = 2 * (Mp + nL) * 4 * 128                  # double-buffered in+out
    vmem_budget = 40 * 1024 * 1024                           # safe on v5e/v6e/v7x
    cols_cap = max(1, vmem_budget // bytes_per_col)
    cols_cap = min(cols_cap, (256 * 1024) // 128)            # v7x (64 MiB) headroom
    min_steps = min(8, n_cols)                               # keep pipeline/megacore fed
    nR = max(_cdiv(n_cols, cols_cap), max(1, min_steps))
    TR = _cdiv(n_cols, nR) * 128
    nR = _cdiv(R128, TR)
    Rp = nR * TR

    kernel = _make_kernel(pair_specs)

    @jax.jit
    def _run(*xs):
        # Build the packed [Mp, Rp] slab in one fused pass:
        #   per l: [n_env, n_feat, m] -> [m, R]; concat over l; pad rows & lanes.
        slab = jnp.concatenate(
            [jnp.transpose(x.reshape(R, 2 * l + 1)).astype(jnp.float32)
             for x, l in zip(xs, ls)],
            axis=0)                                          # [M_tot, R]
        slab = jnp.pad(slab, ((0, Mp - M_tot), (0, Rp - R)))  # [Mp, Rp]

        out = pl.pallas_call(
            kernel,
            out_shape=jax.ShapeDtypeStruct((nL, Rp), jnp.float32),
            grid_spec=pltpu.PrefetchScalarGridSpec(
                num_scalar_prefetch=0,
                grid=(nR,),
                in_specs=[pl.BlockSpec((Mp, TR), lambda r: (0, r))],
                out_specs=pl.BlockSpec((nL, TR), lambda r: (0, r)),
            ),
            compiler_params=pltpu.CompilerParams(
                dimension_semantics=("parallel",),
                vmem_limit_bytes=56 * 1024 * 1024),
        )(slab)

        # [nL, Rp] -> [n_env, (L+1)*n_feat], l-major feature concatenation.
        out = out[:, :R].reshape(nL, n_env, n_feat)
        return jnp.transpose(out, (1, 0, 2)).reshape(n_env, nL * n_feat)

    return _run(*(X_dict[str(l)] for l in ls))


def make_cg_blocks(l_max):
    """Deterministic CG coefficients coupling (l, l) -> lambda=0:
       C_l[m1, m2] = (-1)^(l - m1) / sqrt(2l+1) * delta_{m1, -m2},  m = -l..l."""
    blocks = {}
    for l in range(l_max + 1):
        m = 2 * l + 1
        c = np.zeros((m, m), dtype=np.float32)
        for i1 in range(m):
            m1 = i1 - l
            i2 = (-m1) + l
            c[i1, i2] = ((-1.0) ** (l - m1)) / np.sqrt(2 * l + 1)
        blocks[str(l)] = jnp.asarray(c)
    return blocks


def powerspectrum_reference(X_dict, cg_blocks):
    ls = sorted(int(k) for k in X_dict.keys())
    pieces = []
    for l in ls:
        x = X_dict[str(l)]
        c = cg_blocks[str(l)]
        pieces.append(jnp.einsum('nfa,nfb,ab->nf', x, x, c))
    return jnp.concatenate(pieces, axis=1)


if __name__ == "__main__":
    key = jax.random.PRNGKey(0)
    n_env, n_feat, L_MAX = 2, 8, 3

    cg_blocks = make_cg_blocks(L_MAX)
    X = {}
    for l in range(L_MAX + 1):
        key, sub = jax.random.split(key)
        X[str(l)] = jax.random.normal(sub, (n_env, n_feat, 2 * l + 1), dtype=jnp.float32)

    out = powerspectrum_pallas(X, cg_blocks)
    out = jax.block_until_ready(out)

    ref = powerspectrum_reference(X, cg_blocks)
    assert out.shape == (n_env, (L_MAX + 1) * n_feat)
    np.testing.assert_allclose(np.asarray(out), np.asarray(ref), rtol=1e-5, atol=1e-5)

    print("KERNEL_OK")
</pallas_src>

<mosaic_0001>
module attributes {stable_mosaic.version = 11 : i64} {
  func.func @kernel(%arg0: i32, %arg1: memref<16x128xf32, #tpu.memory_space<vmem>>, %arg2: memref<4x128xf32, #tpu.memory_space<vmem>>) attributes {dimension_semantics = [#tpu.dimension_semantics<parallel>], iteration_bounds = array<i64: 1>, scalar_prefetch = 0 : i64, scratch_operands = 0 : i64, tpu.core_type = #tpu.core_type<tc>, window_params = [{transform_indices = @transform_0, window_bounds = array<i64: 16, 128>}, {transform_indices = @transform_1, window_bounds = array<i64: 4, 128>}]} {
    %c0 = arith.constant 0 : index
    %c0_0 = arith.constant 0 : index
    %0 = vector.load %arg1[%c0, %c0_0] : memref<16x128xf32, #tpu.memory_space<vmem>>, vector<1x128xf32>
    %c0_1 = arith.constant 0 : index
    %c0_2 = arith.constant 0 : index
    %1 = vector.load %arg1[%c0_1, %c0_2] : memref<16x128xf32, #tpu.memory_space<vmem>>, vector<1x128xf32>
    %2 = arith.mulf %0, %1 : vector<1x128xf32>
    %cst = arith.constant 1.000000e+00 : f32
    %3 = vector.broadcast %cst : f32 to vector<1x128xf32>
    %4 = arith.mulf %3, %2 : vector<1x128xf32>
    %c1 = arith.constant 1 : index
    %c0_3 = arith.constant 0 : index
    %5 = vector.load %arg1[%c1, %c0_3] : memref<16x128xf32, #tpu.memory_space<vmem>>, vector<1x128xf32>
    %c3 = arith.constant 3 : index
    %c0_4 = arith.constant 0 : index
    %6 = vector.load %arg1[%c3, %c0_4] : memref<16x128xf32, #tpu.memory_space<vmem>>, vector<1x128xf32>
    %7 = arith.mulf %5, %6 : vector<1x128xf32>
    %cst_5 = arith.constant 1.15470052 : f32
    %8 = vector.broadcast %cst_5 : f32 to vector<1x128xf32>
    %9 = arith.mulf %8, %7 : vector<1x128xf32>
    %c2 = arith.constant 2 : index
    %c0_6 = arith.constant 0 : index
    %10 = vector.load %arg1[%c2, %c0_6] : memref<16x128xf32, #tpu.memory_space<vmem>>, vector<1x128xf32>
    %c2_7 = arith.constant 2 : index
    %c0_8 = arith.constant 0 : index
    %11 = vector.load %arg1[%c2_7, %c0_8] : memref<16x128xf32, #tpu.memory_space<vmem>>, vector<1x128xf32>
    %12 = arith.mulf %10, %11 : vector<1x128xf32>
    %cst_9 = arith.constant -0.577350259 : f32
    %13 = vector.broadcast %cst_9 : f32 to vector<1x128xf32>
    %14 = arith.mulf %13, %12 : vector<1x128xf32>
    %15 = arith.addf %9, %14 : vector<1x128xf32>
    %c4 = arith.constant 4 : index
    %c0_10 = arith.constant 0 : index
    %16 = vector.load %arg1[%c4, %c0_10] : memref<16x128xf32, #tpu.memory_space<vmem>>, vector<1x128xf32>
    %c8 = arith.constant 8 : index
    %c0_11 = arith.constant 0 : index
    %17 = vector.load %arg1[%c8, %c0_11] : memref<16x128xf32, #tpu.memory_space<vmem>>, vector<1x128xf32>
    %18 = arith.mulf %16, %17 : vector<1x128xf32>
    %cst_12 = arith.constant 0.89442718 : f32
    %19 = vector.broadcast %cst_12 : f32 to vector<1x128xf32>
    %20 = arith.mulf %19, %18 : vector<1x128xf32>
    %c5 = arith.constant 5 : index
    %c0_13 = arith.constant 0 : index
    %21 = vector.load %arg1[%c5, %c0_13] : memref<16x128xf32, #tpu.memory_space<vmem>>, vector<1x128xf32>
    %c7 = arith.constant 7 : index
    %c0_14 = arith.constant 0 : index
    %22 = vector.load %arg1[%c7, %c0_14] : memref<16x128xf32, #tpu.memory_space<vmem>>, vector<1x128xf32>
    %23 = arith.mulf %21, %22 : vector<1x128xf32>
    %cst_15 = arith.constant -0.89442718 : f32
    %24 = vector.broadcast %cst_15 : f32 to vector<1x128xf32>
    %25 = arith.mulf %24, %23 : vector<1x128xf32>
    %26 = arith.addf %20, %25 : vector<1x128xf32>
    %c6 = arith.constant 6 : index
    %c0_16 = arith.constant 0 : index
    %27 = vector.load %arg1[%c6, %c0_16] : memref<16x128xf32, #tpu.memory_space<vmem>>, vector<1x128xf32>
    %c6_17 = arith.constant 6 : index
    %c0_18 = arith.constant 0 : index
    %28 = vector.load %arg1[%c6_17, %c0_18] : memref<16x128xf32, #tpu.memory_space<vmem>>, vector<1x128xf32>
    %29 = arith.mulf %27, %28 : vector<1x128xf32>
    %cst_19 = arith.constant 0.44721359 : f32
    %30 = vector.broadcast %cst_19 : f32 to vector<1x128xf32>
    %31 = arith.mulf %30, %29 : vector<1x128xf32>
    %32 = arith.addf %26, %31 : vector<1x128xf32>
    %c9 = arith.constant 9 : index
    %c0_20 = arith.constant 0 : index
    %33 = vector.load %arg1[%c9, %c0_20] : memref<16x128xf32, #tpu.memory_space<vmem>>, vector<1x128xf32>
    %c15 = arith.constant 15 : index
    %c0_21 = arith.constant 0 : index
    %34 = vector.load %arg1[%c15, %c0_21] : memref<16x128xf32, #tpu.memory_space<vmem>>, vector<1x128xf32>
    %35 = arith.mulf %33, %34 : vector<1x128xf32>
    %cst_22 = arith.constant 0.755928933 : f32
    %36 = vector.broadcast %cst_22 : f32 to vector<1x128xf32>
    %37 = arith.mulf %36, %35 : vector<1x128xf32>
    %c10 = arith.constant 10 : index
    %c0_23 = arith.constant 0 : index
    %38 = vector.load %arg1[%c10, %c0_23] : memref<16x128xf32, #tpu.memory_space<vmem>>, vector<1x128xf32>
    %c14 = arith.constant 14 : index
    %c0_24 = arith.constant 0 : index
    %39 = vector.load %arg1[%c14, %c0_24] : memref<16x128xf32, #tpu.memory_space<vmem>>, vector<1x128xf32>
    %40 = arith.mulf %38, %39 : vector<1x128xf32>
    %cst_25 = arith.constant -0.755928933 : f32
    %41 = vector.broadcast %cst_25 : f32 to vector<1x128xf32>
    %42 = arith.mulf %41, %40 : vector<1x128xf32>
    %43 = arith.addf %37, %42 : vector<1x128xf32>
    %c11 = arith.constant 11 : index
    %c0_26 = arith.constant 0 : index
    %44 = vector.load %arg1[%c11, %c0_26] : memref<16x128xf32, #tpu.memory_space<vmem>>, vector<1x128xf32>
    %c13 = arith.constant 13 : index
    %c0_27 = arith.constant 0 : index
    %45 = vector.load %arg1[%c13, %c0_27] : memref<16x128xf32, #tpu.memory_space<vmem>>, vector<1x128xf32>
    %46 = arith.mulf %44, %45 : vector<1x128xf32>
    %cst_28 = arith.constant 0.755928933 : f32
    %47 = vector.broadcast %cst_28 : f32 to vector<1x128xf32>
    %48 = arith.mulf %47, %46 : vector<1x128xf32>
    %49 = arith.addf %43, %48 : vector<1x128xf32>
    %c12 = arith.constant 12 : index
    %c0_29 = arith.constant 0 : index
    %50 = vector.load %arg1[%c12, %c0_29] : memref<16x128xf32, #tpu.memory_space<vmem>>, vector<1x128xf32>
    %c12_30 = arith.constant 12 : index
    %c0_31 = arith.constant 0 : index
    %51 = vector.load %arg1[%c12_30, %c0_31] : memref<16x128xf32, #tpu.memory_space<vmem>>, vector<1x128xf32>
    %52 = arith.mulf %50, %51 : vector<1x128xf32>
    %cst_32 = arith.constant -0.377964467 : f32
    %53 = vector.broadcast %cst_32 : f32 to vector<1x128xf32>
    %54 = arith.mulf %53, %52 : vector<1x128xf32>
    %55 = arith.addf %49, %54 : vector<1x128xf32>
    %56 = tpu.concatenate %4, %15, %32, %55 in 0 : vector<1x128xf32>, vector<1x128xf32>, vector<1x128xf32>, vector<1x128xf32> -> vector<4x128xf32>
    %c0_33 = arith.constant 0 : index
    %c0_34 = arith.constant 0 : index
    %57 = vector.load %arg2[%c0_33, %c0_34] : memref<4x128xf32, #tpu.memory_space<vmem>>, vector<4x128xf32>
    tpu.vector_store %arg2[%c0_33, %c0_34], %56 {strides = array<i32>} : memref<4x128xf32, #tpu.memory_space<vmem>>, vector<4x128xf32>,
    return
  }
  func.func @transform_0(%arg0: i32) -> (i32, i32) {
    %c0_i32 = arith.constant 0 : i32
    %c0_i32_0 = arith.constant 0 : i32
    return %c0_i32, %arg0 : i32, i32
  }
  func.func @transform_1(%arg0: i32) -> (i32, i32) {
    %c0_i32 = arith.constant 0 : i32
    %c0_i32_0 = arith.constant 0 : i32
    return %c0_i32, %arg0 : i32, i32
  }
}

</mosaic_0001>

<bundles_post_ra>
// kernel: _run.1
= control target key start
LH: loop header
LB: loop body
LE: loop exit
PB: predicated region body
PF: predicated region fallthrough
CT: control target
= control target key end

     0   :  { %vm58_vm0 = vcmask 1040384   ;;  %vm60_vm1 = vcmask 1041408   ;;  %vm62_vm2 = vcmask 1042432   ;;  %s130_s0 = inlined_call_operand.vmem [shape: f32[16,128], index: 0, kind: input, shape index: {}]   ;;  %s131_s1 = inlined_call_operand.vmem [shape: f32[4,128], index: 1, kind: output, shape index: {}]  }
   0x1   :  { %v10_v0 = vld [vmem:[%s130_s0 + $0x1] sm:$0x1]  ;;  %v11_v1 = vld [vmem:[%s130_s0 + $0x3] sm:$0x1]  ;;  %v14_v3 = vld [vmem:[%s130_s0 + $0x2] sm:$0x1] }
   0x2   :  { %v12_v2 = vmul.f32 %v11_v1, %v10_v0  ;;  %v18_v4 = vld [vmem:[%s130_s0 + $0x4] sm:$0x1]  ;;  %v19_v5 = vld [vmem:[%s130_s0 + $0x8] sm:$0x1]  ;;  %v15_v6 = vmul.f32 %v14_v3, %v14_v3  ;;  %v22_v8 = vld [vmem:[%s130_s0 + $0x5] sm:$0x1] }
   0x3   :  { %v20_v7 = vmul.f32 %v19_v5, %v18_v4  ;;  %v23_v9 = vld [vmem:[%s130_s0 + $0x7] sm:$0x1]  ;;  %v27_v10 = vld [vmem:[%s130_s0 + $0x6] sm:$0x1]  ;;  %v8_v11 = vld [vmem:[%s130_s0] sm:$0x1] }
   0x4   :  { %v13_v12 = vmul.f32 1.1547005, %v12_v2  ;;  %v24_v13 = vmul.f32 %v23_v9, %v22_v8  ;;  %v28_v14 = vmul.f32 %v27_v10, %v27_v10  ;;  %v31_v15 = vld [vmem:[%s130_s0 + $0x9] sm:$0x1]  ;;  %v32_v16 = vld [vmem:[%s130_s0 + $0xf] sm:$0x1]  ;;  %v9_v32 = vmul.f32 %v8_v11, %v8_v11 }
   0x5   :  { %v16_v17 = vmul.f32 -0.57735026, %v15_v6  ;;  %v21_v18 = vmul.f32 0.8944272, %v20_v7  ;;  %v33_v19 = vmul.f32 %v32_v16, %v31_v15  ;;  %v35_v20 = vld [vmem:[%s130_s0 + $0xa] sm:$0x1] }
   0x6   :  { %v25_v21 = vmul.f32 -0.8944272, %v24_v13  ;;  %v29_v22 = vmul.f32 0.4472136, %v28_v14  ;;  %v36_v23 = vld [vmem:[%s130_s0 + $0xe] sm:$0x1] }
   0x7   :  { %v17_v24 = vadd.f32 %v16_v17, %v13_v12  ;;  %v34_v25 = vmul.f32 0.75592893, %v33_v19  ;;  %v37_v26 = vmul.f32 %v36_v23, %v35_v20  ;;  %v40_v27 = vld [vmem:[%s130_s0 + $0xb] sm:$0x1]  ;;  %v41_v28 = vld [vmem:[%s130_s0 + $0xd] sm:$0x1] }
   0x8   :  { %v26_v29 = vadd.f32 %v25_v21, %v21_v18  ;;  %v42_v30 = vmul.f32 %v41_v28, %v40_v27  ;;  %v45_v31 = vld [vmem:[%s130_s0 + $0xc] sm:$0x1] }
   0x9   :  { %v38_v33 = vmul.f32 -0.75592893, %v37_v26  ;;  %v46_v34 = vmul.f32 %v45_v31, %v45_v31  ;;  %v50_v35 = vrot.slane %v17_v24, 7 }
   0xa   :  { %v30_v36 = vadd.f32 %v29_v22, %v26_v29  ;;  %v43_v37 = vmul.f32 0.75592893, %v42_v30 }
   0xb   :  { %v39_v38 = vadd.f32 %v38_v33, %v34_v25  ;;  %v47_v39 = vmul.f32 -0.37796447, %v46_v34  ;;  %v59_v42 = vsel %vm58_vm0, %v9_v32, %v50_v35 }
   0xc   :  { %v53_v40 = vrot.slane %v30_v36, 6 }
   0xd   :  { %v44_v41 = vadd.f32 %v43_v37, %v39_v38 }
   0xe   :  { %v61_v44 = vsel %vm60_vm1, %v59_v42, %v53_v40 }
   0xf   :  { %v48_v43 = vadd.f32 %v47_v39, %v44_v41 }
  0x11   :  { %v56_v45 = vrot.slane %v48_v43, 5 }
  0x13   :  { %v63_v46 = vsel %vm62_vm2, %v61_v44, %v56_v45 }
  0x14   :  { %64 = vst [vmem:[%s131_s1] sm:$0xf] %v63_v46 }

</bundles_post_ra>
